<compile_context>
chip_gen: v6e
topology: v6e:2x2x1
jax: 0.10.0
libtpu: 0.0.40
codegen_flags: <defaults>
</compile_context>

<pallas_src>
import jax
import jax.numpy as jnp
from jax.experimental import pallas as pl
from jax.experimental.pallas import tpu as pltpu

EPS = 1e-5


def _build_row_toeplitz(weight, W):
    """(Cout, Cin, 3, 3) -> T of shape (3, W*Cin, W*Cout) with
       T[dy, (x+dx-1)*Cin + ci, x*Cout + co] = weight[co, ci, dy, dx]
       for 0 <= x+dx-1 < W (out-of-range taps are zero = 'same' padding).
    Folds the dx taps, the Cin contraction and the W-direction zero padding
    into one lane-dense matmul operand.  Tiny: 3 * (W*Cin) * (W*Cout)."""
    w_t = jnp.transpose(weight, (2, 3, 1, 0))  # (3, 3, Cin, Cout)
    mats = []
    for dy in range(3):
        t = None
        for dx in range(3):
            # S[x+dx-1, x] = 1  (boundary rows truncated by eye -> zero pad)
            shift = jnp.eye(W, W, k=1 - dx, dtype=weight.dtype)
            blk = jnp.kron(shift, w_t[dy, dx])          # (W*Cin, W*Cout)
            t = blk if t is None else t + blk
        mats.append(t)
    return jnp.stack(mats, axis=0)


def conv_stats_kernel(x_ref, t_ref, y_ref, stats_ref, acc_ref):
    # x_ref    : (H+2, W*Cin)    H-padded rows of one image (same block for all i)
    # t_ref    : (3, W*Cin, W*Cout)  block-Toeplitz conv weights
    # y_ref    : (TH, W*Cout)    pre-BN conv output tile (f32, lane-dense)
    # stats_ref: (2, W*Cout)     per-image (sum, sum_sq), accumulated over i
    # acc_ref  : (TH, W*Cout)    f32 VMEM scratch accumulator
    i = pl.program_id(1)
    th = y_ref.shape[0]
    r0 = i * th                      # first padded row feeding this output tile

    # 3x3 conv == 3 sublane-shifted matmuls (one per dy).  dx shifts / Cin
    # contraction / W-padding live inside t_ref, so there are no per-tap
    # relayout copies and each MXU call has K=W*Cin, N=W*Cout.
    acc_ref[...] = jnp.zeros_like(acc_ref)
    for dy in range(3):
        rows = x_ref[pl.ds(r0 + dy, th), :]
        acc_ref[...] += jnp.dot(rows, t_ref[dy],
                                preferred_element_type=jnp.float32)
    y = acc_ref[...]
    y_ref[...] = y.astype(y_ref.dtype)

    # Partial BN statistics, kept lane-dense; the (W, Cout) unfold + reduction
    # over W happens once on O(W*Cout) data in the wrapper.
    part = jnp.concatenate(
        [jnp.sum(y, axis=0, keepdims=True),
         jnp.sum(y * y, axis=0, keepdims=True)], axis=0)

    @pl.when(i == 0)
    def _init():
        stats_ref[...] = jnp.zeros_like(stats_ref)

    stats_ref[...] += part


def bn_relu_kernel(y_ref, scale_ref, shift_ref, o_ref):
    o_ref[...] = jnp.maximum(
        y_ref[...] * scale_ref[...] + shift_ref[...], 0.0).astype(o_ref.dtype)


def conv_bn_relu_forward(x_nchw, weight, bias, gamma, beta):
    """Conv2d(3x3, s=1, p=1) + BatchNorm2d (training stats) + ReLU.

    x_nchw: (N, Cin, H, W); weight: (Cout, Cin, 3, 3); returns (N, Cout, H, W).
    `bias` is accepted for API parity but not applied in-kernel: training-mode
    BN subtracts the batch mean right after, which cancels it exactly.
    """
    del bias
    N, Cin, H, W = x_nchw.shape
    Cout = weight.shape[0]

    th = 8 if H % 8 == 0 else H        # output rows per tile (sublane multiple)
    num_h = H // th
    wci = W * Cin                      # input lane width
    wco = W * Cout                     # output lane width (128 in the demo)

    # Single fused layout pass: NCHW -> NHWC with (W, Cin) fused into lanes,
    # plus H-padding by 1.  W-padding is folded into the Toeplitz weights.
    x_rows = jnp.transpose(x_nchw, (0, 2, 3, 1)).reshape(N, H, wci)
    x_pad = jnp.pad(x_rows, ((0, 0), (1, 1), (0, 0)))

    t_mats = _build_row_toeplitz(weight, W)          # (3, W*Cin, W*Cout)

    # ---- pass 1: conv + per-image partial BN statistics --------------------
    y, stats = pl.pallas_call(
        conv_stats_kernel,
        out_shape=(
            jax.ShapeDtypeStruct((N, H, wco), jnp.float32),
            jax.ShapeDtypeStruct((N, 2, wco), jnp.float32),
        ),
        grid=(N, num_h),
        in_specs=[
            # Block index constant in i -> the (small) padded image is DMA'd
            # once per n and revisited for every H tile (halo handled in VMEM
            # by the dy sublane slices above).
            pl.BlockSpec((None, H + 2, wci), lambda n, i: (n, 0, 0)),
            pl.BlockSpec((3, wci, wco), lambda n, i: (0, 0, 0)),
        ],
        out_specs=(
            pl.BlockSpec((None, th, wco), lambda n, i: (n, i, 0)),
            # Same block for every i -> resident accumulator over the
            # 'arbitrary' H-tile axis (initialised at i == 0 in the kernel).
            pl.BlockSpec((None, 2, wco), lambda n, i: (n, 0, 0)),
        ),
        scratch_shapes=[pltpu.VMEM((th, wco), jnp.float32)],
        compiler_params=pltpu.CompilerParams(
            dimension_semantics=("parallel", "arbitrary"),
            vmem_limit_bytes=32 * 1024 * 1024,   # well under v7x's 64 MiB VMEM
        ),
    )(x_pad, t_mats)

    # ---- tiny stats reduction + BN affine folding (O(N*W*Cout)) ------------
    s = jnp.sum(stats, axis=0).reshape(2, W, Cout).sum(axis=1)     # (2, Cout)
    count = N * H * W
    mean = s[0] / count
    var = jnp.maximum(s[1] / count - mean * mean, 0.0)             # biased, BN(train)
    inv_std = jax.lax.rsqrt(var + EPS)
    scale = gamma * inv_std
    shift = beta - mean * scale
    scale_l = jnp.tile(scale, W).reshape(1, wco).astype(jnp.float32)
    shift_l = jnp.tile(shift, W).reshape(1, wco).astype(jnp.float32)

    # ---- pass 2: normalize + affine + ReLU (lane-dense elementwise sweep) ---
    out_rows = pl.pallas_call(
        bn_relu_kernel,
        out_shape=jax.ShapeDtypeStruct((N, H, wco), x_nchw.dtype),
        grid=(N, num_h),
        in_specs=[
            pl.BlockSpec((None, th, wco), lambda n, i: (n, i, 0)),
            pl.BlockSpec((1, wco), lambda n, i: (0, 0)),
            pl.BlockSpec((1, wco), lambda n, i: (0, 0)),
        ],
        out_specs=pl.BlockSpec((None, th, wco), lambda n, i: (n, i, 0)),
        compiler_params=pltpu.CompilerParams(
            dimension_semantics=("parallel", "parallel"),
            vmem_limit_bytes=32 * 1024 * 1024,
        ),
    )(y, scale_l, shift_l)

    # Back to the PyTorch NCHW public layout (skipped in an NHWC-native model).
    return jnp.transpose(out_rows.reshape(N, H, W, Cout), (0, 3, 1, 2))


def reference_forward(x, weight, bias, gamma, beta):
    """Pure-JAX reference matching the PyTorch module (training-mode BN)."""
    y = jax.lax.conv_general_dilated(
        x, weight, window_strides=(1, 1), padding=((1, 1), (1, 1)),
        dimension_numbers=("NCHW", "OIHW", "NCHW"))
    y = y + bias[None, :, None, None]
    mean = jnp.mean(y, axis=(0, 2, 3), keepdims=True)
    var = jnp.mean((y - mean) ** 2, axis=(0, 2, 3), keepdims=True)
    y = (y - mean) * jax.lax.rsqrt(var + EPS)
    y = y * gamma[None, :, None, None] + beta[None, :, None, None]
    return jnp.maximum(y, 0.0)


if __name__ == "__main__":
    key = jax.random.PRNGKey(0)
    kx, kw, kb = jax.random.split(key, 3)

    N, Cin, Cout, H, W = 2, 4, 8, 16, 16

    x = jax.random.normal(kx, (N, Cin, H, W), dtype=jnp.float32)

    fan_in = Cin * 3 * 3
    bound = 1.0 / (fan_in ** 0.5)
    weight = jax.random.uniform(kw, (Cout, Cin, 3, 3), jnp.float32,
                                minval=-bound, maxval=bound)
    bias = jax.random.uniform(kb, (Cout,), jnp.float32,
                              minval=-bound, maxval=bound)
    gamma = jnp.ones((Cout,), jnp.float32)
    beta = jnp.zeros((Cout,), jnp.float32)

    fwd = jax.jit(conv_bn_relu_forward)
    out = fwd(x, weight, bias, gamma, beta)
    out = jax.block_until_ready(out)

    ref = reference_forward(x, weight, bias, gamma, beta)
    assert out.shape == (N, Cout, H, W)
    assert jnp.allclose(out, ref, atol=1e-4, rtol=1e-4), \
        f"max abs err {jnp.max(jnp.abs(out - ref))}"

    print("KERNEL_OK")
</pallas_src>

<mosaic_0001>
module attributes {stable_mosaic.version = 11 : i64} {
  func.func @bn_relu_kernel(%arg0: i32, %arg1: i32, %arg2: memref<1x8x128xf32, #tpu.memory_space<vmem>>, %arg3: memref<1x128xf32, #tpu.memory_space<vmem>>, %arg4: memref<1x128xf32, #tpu.memory_space<vmem>>, %arg5: memref<1x8x128xf32, #tpu.memory_space<vmem>>) attributes {dimension_semantics = [#tpu.dimension_semantics<parallel>, #tpu.dimension_semantics<parallel>], iteration_bounds = array<i64: 2, 2>, scalar_prefetch = 0 : i64, scratch_operands = 0 : i64, tpu.core_type = #tpu.core_type<tc>, window_params = [{transform_indices = @transform_0, window_bounds = array<i64: 1, 8, 128>}, {pipeline_mode = #tpu.pipeline_mode<synchronous>, transform_indices = @transform_1, window_bounds = array<i64: 1, 128>}, {pipeline_mode = #tpu.pipeline_mode<synchronous>, transform_indices = @transform_2, window_bounds = array<i64: 1, 128>}, {transform_indices = @transform_3, window_bounds = array<i64: 1, 8, 128>}]} {
    %c0 = arith.constant 0 : index
    %c0_0 = arith.constant 0 : index
    %c0_1 = arith.constant 0 : index
    %0 = vector.load %arg2[%c0, %c0_0, %c0_1] : memref<1x8x128xf32, #tpu.memory_space<vmem>>, vector<1x8x128xf32>
    %1 = vector.shape_cast %0 : vector<1x8x128xf32> to vector<8x128xf32>
    %c0_2 = arith.constant 0 : index
    %c0_3 = arith.constant 0 : index
    %2 = vector.load %arg3[%c0_2, %c0_3] : memref<1x128xf32, #tpu.memory_space<vmem>>, vector<1x128xf32>
    %3 = vector.broadcast %2 : vector<1x128xf32> to vector<8x128xf32>
    %4 = arith.mulf %1, %3 : vector<8x128xf32>
    %c0_4 = arith.constant 0 : index
    %c0_5 = arith.constant 0 : index
    %5 = vector.load %arg4[%c0_4, %c0_5] : memref<1x128xf32, #tpu.memory_space<vmem>>, vector<1x128xf32>
    %6 = vector.broadcast %5 : vector<1x128xf32> to vector<8x128xf32>
    %7 = arith.addf %4, %6 : vector<8x128xf32>
    %cst = arith.constant 0.000000e+00 : f32
    %8 = vector.broadcast %cst : f32 to vector<8x128xf32>
    %9 = arith.maximumf %7, %8 : vector<8x128xf32>
    %c0_6 = arith.constant 0 : index
    %c0_7 = arith.constant 0 : index
    %c0_8 = arith.constant 0 : index
    %10 = vector.load %arg5[%c0_6, %c0_7, %c0_8] : memref<1x8x128xf32, #tpu.memory_space<vmem>>, vector<1x8x128xf32>
    %11 = vector.shape_cast %10 : vector<1x8x128xf32> to vector<8x128xf32>
    %12 = vector.shape_cast %9 : vector<8x128xf32> to vector<1x8x128xf32>
    tpu.vector_store %arg5[%c0_6, %c0_7, %c0_8], %12 {strides = array<i32>} : memref<1x8x128xf32, #tpu.memory_space<vmem>>, vector<1x8x128xf32>,
    return
  }
  func.func @transform_0(%arg0: i32, %arg1: i32) -> (i32, i32, i32) {
    %c0_i32 = arith.constant 0 : i32
    %c0_i32_0 = arith.constant 0 : i32
    return %arg0, %arg1, %c0_i32 : i32, i32, i32
  }
  func.func @transform_1(%arg0: i32, %arg1: i32) -> (i32, i32) {
    %c0_i32 = arith.constant 0 : i32
    %c0_i32_0 = arith.constant 0 : i32
    %c0_i32_1 = arith.constant 0 : i32
    return %c0_i32, %c0_i32_0 : i32, i32
  }
  func.func @transform_2(%arg0: i32, %arg1: i32) -> (i32, i32) {
    %c0_i32 = arith.constant 0 : i32
    %c0_i32_0 = arith.constant 0 : i32
    %c0_i32_1 = arith.constant 0 : i32
    return %c0_i32, %c0_i32_0 : i32, i32
  }
  func.func @transform_3(%arg0: i32, %arg1: i32) -> (i32, i32, i32) {
    %c0_i32 = arith.constant 0 : i32
    %c0_i32_0 = arith.constant 0 : i32
    return %arg0, %arg1, %c0_i32 : i32, i32, i32
  }
}

module attributes {stable_mosaic.version = 11 : i64} {
  func.func @conv_stats_kernel(%arg0: i32, %arg1: i32, %arg2: memref<1x18x64xf32, #tpu.memory_space<vmem>>, %arg3: memref<3x64x128xf32, #tpu.memory_space<vmem>>, %arg4: memref<1x8x128xf32, #tpu.memory_space<vmem>>, %arg5: memref<1x2x128xf32, #tpu.memory_space<vmem>>, %arg6: memref<8x128xf32, #tpu.memory_space<vmem>>) attributes {dimension_semantics = [#tpu.dimension_semantics<parallel>, #tpu.dimension_semantics<arbitrary>], iteration_bounds = array<i64: 2, 2>, scalar_prefetch = 0 : i64, scratch_operands = 1 : i64, tpu.core_type = #tpu.core_type<tc>, window_params = [{transform_indices = @transform_0, window_bounds = array<i64: 1, 18, 64>}, {pipeline_mode = #tpu.pipeline_mode<synchronous>, transform_indices = @transform_1, window_bounds = array<i64: 3, 64, 128>}, {transform_indices = @transform_2, window_bounds = array<i64: 1, 8, 128>}, {transform_indices = @transform_3, window_bounds = array<i64: 1, 2, 128>}]} {
    %c8_i32 = arith.constant 8 : i32
    %0 = arith.muli %arg1, %c8_i32 : i32
    %cst = arith.constant 0.000000e+00 : f32
    %1 = vector.broadcast %cst : f32 to vector<8x128xf32>
    %c0 = arith.constant 0 : index
    %c0_0 = arith.constant 0 : index
    %2 = vector.load %arg6[%c0, %c0_0] : memref<8x128xf32, #tpu.memory_space<vmem>>, vector<8x128xf32>
    tpu.vector_store %arg6[%c0, %c0_0], %1 {strides = array<i32>} : memref<8x128xf32, #tpu.memory_space<vmem>>, vector<8x128xf32>,
    %c0_i32 = arith.constant 0 : i32
    %3 = arith.addi %0, %c0_i32 : i32
    %c0_1 = arith.constant 0 : index
    %4 = arith.index_cast %3 : i32 to index
    %c0_2 = arith.constant 0 : index
    %5 = vector.load %arg2[%c0_1, %4, %c0_2] : memref<1x18x64xf32, #tpu.memory_space<vmem>>, vector<1x8x64xf32>
    %6 = vector.shape_cast %5 : vector<1x8x64xf32> to vector<8x64xf32>
    %c0_3 = arith.constant 0 : index
    %c0_4 = arith.constant 0 : index
    %7 = vector.load %arg6[%c0_3, %c0_4] : memref<8x128xf32, #tpu.memory_space<vmem>>, vector<8x128xf32>
    %c0_5 = arith.constant 0 : index
    %c0_6 = arith.constant 0 : index
    %c0_7 = arith.constant 0 : index
    %8 = vector.load %arg3[%c0_5, %c0_6, %c0_7] : memref<3x64x128xf32, #tpu.memory_space<vmem>>, vector<1x64x128xf32>
    %9 = vector.shape_cast %8 : vector<1x64x128xf32> to vector<64x128xf32>
    %cst_8 = arith.constant dense<0.000000e+00> : vector<8x128xf32>
    %10 = tpu.matmul %6, %9, %cst_8 {dimension_numbers = #tpu.dot_dimension_numbers<[1], [0], [0], [1], [0, 0, 1, 1], [], []>} : vector<8x64xf32>, vector<64x128xf32>, vector<8x128xf32> -> vector<8x128xf32>
    %11 = arith.addf %7, %10 : vector<8x128xf32>
    %c0_9 = arith.constant 0 : index
    %c0_10 = arith.constant 0 : index
    %12 = vector.load %arg6[%c0_9, %c0_10] : memref<8x128xf32, #tpu.memory_space<vmem>>, vector<8x128xf32>
    tpu.vector_store %arg6[%c0_9, %c0_10], %11 {strides = array<i32>} : memref<8x128xf32, #tpu.memory_space<vmem>>, vector<8x128xf32>,
    %c1_i32 = arith.constant 1 : i32
    %13 = arith.addi %0, %c1_i32 : i32
    %c0_11 = arith.constant 0 : index
    %14 = arith.index_cast %13 : i32 to index
    %c0_12 = arith.constant 0 : index
    %15 = vector.load %arg2[%c0_11, %14, %c0_12] : memref<1x18x64xf32, #tpu.memory_space<vmem>>, vector<1x8x64xf32>
    %16 = vector.shape_cast %15 : vector<1x8x64xf32> to vector<8x64xf32>
    %c0_13 = arith.constant 0 : index
    %c0_14 = arith.constant 0 : index
    %17 = vector.load %arg6[%c0_13, %c0_14] : memref<8x128xf32, #tpu.memory_space<vmem>>, vector<8x128xf32>
    %c1 = arith.constant 1 : index
    %c0_15 = arith.constant 0 : index
    %c0_16 = arith.constant 0 : index
    %18 = vector.load %arg3[%c1, %c0_15, %c0_16] : memref<3x64x128xf32, #tpu.memory_space<vmem>>, vector<1x64x128xf32>
    %19 = vector.shape_cast %18 : vector<1x64x128xf32> to vector<64x128xf32>
    %cst_17 = arith.constant dense<0.000000e+00> : vector<8x128xf32>
    %20 = tpu.matmul %16, %19, %cst_17 {dimension_numbers = #tpu.dot_dimension_numbers<[1], [0], [0], [1], [0, 0, 1, 1], [], []>} : vector<8x64xf32>, vector<64x128xf32>, vector<8x128xf32> -> vector<8x128xf32>
    %21 = arith.addf %17, %20 : vector<8x128xf32>
    %c0_18 = arith.constant 0 : index
    %c0_19 = arith.constant 0 : index
    %22 = vector.load %arg6[%c0_18, %c0_19] : memref<8x128xf32, #tpu.memory_space<vmem>>, vector<8x128xf32>
    tpu.vector_store %arg6[%c0_18, %c0_19], %21 {strides = array<i32>} : memref<8x128xf32, #tpu.memory_space<vmem>>, vector<8x128xf32>,
    %c2_i32 = arith.constant 2 : i32
    %23 = arith.addi %0, %c2_i32 : i32
    %c0_20 = arith.constant 0 : index
    %24 = arith.index_cast %23 : i32 to index
    %c0_21 = arith.constant 0 : index
    %25 = vector.load %arg2[%c0_20, %24, %c0_21] : memref<1x18x64xf32, #tpu.memory_space<vmem>>, vector<1x8x64xf32>
    %26 = vector.shape_cast %25 : vector<1x8x64xf32> to vector<8x64xf32>
    %c0_22 = arith.constant 0 : index
    %c0_23 = arith.constant 0 : index
    %27 = vector.load %arg6[%c0_22, %c0_23] : memref<8x128xf32, #tpu.memory_space<vmem>>, vector<8x128xf32>
    %c2 = arith.constant 2 : index
    %c0_24 = arith.constant 0 : index
    %c0_25 = arith.constant 0 : index
    %28 = vector.load %arg3[%c2, %c0_24, %c0_25] : memref<3x64x128xf32, #tpu.memory_space<vmem>>, vector<1x64x128xf32>
    %29 = vector.shape_cast %28 : vector<1x64x128xf32> to vector<64x128xf32>
    %cst_26 = arith.constant dense<0.000000e+00> : vector<8x128xf32>
    %30 = tpu.matmul %26, %29, %cst_26 {dimension_numbers = #tpu.dot_dimension_numbers<[1], [0], [0], [1], [0, 0, 1, 1], [], []>} : vector<8x64xf32>, vector<64x128xf32>, vector<8x128xf32> -> vector<8x128xf32>
    %31 = arith.addf %27, %30 : vector<8x128xf32>
    %c0_27 = arith.constant 0 : index
    %c0_28 = arith.constant 0 : index
    %32 = vector.load %arg6[%c0_27, %c0_28] : memref<8x128xf32, #tpu.memory_space<vmem>>, vector<8x128xf32>
    tpu.vector_store %arg6[%c0_27, %c0_28], %31 {strides = array<i32>} : memref<8x128xf32, #tpu.memory_space<vmem>>, vector<8x128xf32>,
    %c0_29 = arith.constant 0 : index
    %c0_30 = arith.constant 0 : index
    %33 = vector.load %arg6[%c0_29, %c0_30] : memref<8x128xf32, #tpu.memory_space<vmem>>, vector<8x128xf32>
    %c0_31 = arith.constant 0 : index
    %c0_32 = arith.constant 0 : index
    %c0_33 = arith.constant 0 : index
    %34 = vector.load %arg4[%c0_31, %c0_32, %c0_33] : memref<1x8x128xf32, #tpu.memory_space<vmem>>, vector<1x8x128xf32>
    %35 = vector.shape_cast %34 : vector<1x8x128xf32> to vector<8x128xf32>
    %36 = vector.shape_cast %33 : vector<8x128xf32> to vector<1x8x128xf32>
    tpu.vector_store %arg4[%c0_31, %c0_32, %c0_33], %36 {strides = array<i32>} : memref<1x8x128xf32, #tpu.memory_space<vmem>>, vector<1x8x128xf32>,
    %cst_34 = arith.constant dense<0.000000e+00> : vector<128xf32>
    %37 = vector.multi_reduction <add>, %33, %cst_34 [0] : vector<8x128xf32> to vector<128xf32>
    %38 = vector.shape_cast %37 : vector<128xf32> to vector<1x128xf32>
    %39 = arith.mulf %33, %33 : vector<8x128xf32>
    %cst_35 = arith.constant dense<0.000000e+00> : vector<128xf32>
    %40 = vector.multi_reduction <add>, %39, %cst_35 [0] : vector<8x128xf32> to vector<128xf32>
    %41 = vector.shape_cast %40 : vector<128xf32> to vector<1x128xf32>
    %42 = tpu.concatenate %38, %41 in 0 : vector<1x128xf32>, vector<1x128xf32> -> vector<2x128xf32>
    %c0_i32_36 = arith.constant 0 : i32
    %43 = arith.cmpi eq, %arg1, %c0_i32_36 : i32
    %44 = arith.extui %43 : i1 to i32
    %c0_i32_37 = arith.constant 0 : i32
    %45 = arith.cmpi ne, %44, %c0_i32_37 : i32
    scf.if %45 {
      %cst_44 = arith.constant 0.000000e+00 : f32
      %52 = vector.broadcast %cst_44 : f32 to vector<2x128xf32>
      %c0_45 = arith.constant 0 : index
      %c0_46 = arith.constant 0 : index
      %c0_47 = arith.constant 0 : index
      %53 = vector.load %arg5[%c0_45, %c0_46, %c0_47] : memref<1x2x128xf32, #tpu.memory_space<vmem>>, vector<1x2x128xf32>
      %54 = vector.shape_cast %53 : vector<1x2x128xf32> to vector<2x128xf32>
      %55 = vector.shape_cast %52 : vector<2x128xf32> to vector<1x2x128xf32>
      tpu.vector_store %arg5[%c0_45, %c0_46, %c0_47], %55 {strides = array<i32>} : memref<1x2x128xf32, #tpu.memory_space<vmem>>, vector<1x2x128xf32>,
    } else {
    }
    %c0_38 = arith.constant 0 : index
    %c0_39 = arith.constant 0 : index
    %c0_40 = arith.constant 0 : index
    %46 = vector.load %arg5[%c0_38, %c0_39, %c0_40] : memref<1x2x128xf32, #tpu.memory_space<vmem>>, vector<1x2x128xf32>
    %47 = vector.shape_cast %46 : vector<1x2x128xf32> to vector<2x128xf32>
    %48 = arith.addf %47, %42 : vector<2x128xf32>
    %c0_41 = arith.constant 0 : index
    %c0_42 = arith.constant 0 : index
    %c0_43 = arith.constant 0 : index
    %49 = vector.load %arg5[%c0_41, %c0_42, %c0_43] : memref<1x2x128xf32, #tpu.memory_space<vmem>>, vector<1x2x128xf32>
    %50 = vector.shape_cast %49 : vector<1x2x128xf32> to vector<2x128xf32>
    %51 = vector.shape_cast %48 : vector<2x128xf32> to vector<1x2x128xf32>
    tpu.vector_store %arg5[%c0_41, %c0_42, %c0_43], %51 {strides = array<i32>} : memref<1x2x128xf32, #tpu.memory_space<vmem>>, vector<1x2x128xf32>,
    return
  }
  func.func @transform_0(%arg0: i32, %arg1: i32) -> (i32, i32, i32) {
    %c0_i32 = arith.constant 0 : i32
    %c0_i32_0 = arith.constant 0 : i32
    %c0_i32_1 = arith.constant 0 : i32
    return %arg0, %c0_i32, %c0_i32_0 : i32, i32, i32
  }
  func.func @transform_1(%arg0: i32, %arg1: i32) -> (i32, i32, i32) {
    %c0_i32 = arith.constant 0 : i32
    %c0_i32_0 = arith.constant 0 : i32
    %c0_i32_1 = arith.constant 0 : i32
    %c0_i32_2 = arith.constant 0 : i32
    return %c0_i32, %c0_i32_0, %c0_i32_1 : i32, i32, i32
  }
  func.func @transform_2(%arg0: i32, %arg1: i32) -> (i32, i32, i32) {
    %c0_i32 = arith.constant 0 : i32
    %c0_i32_0 = arith.constant 0 : i32
    return %arg0, %arg1, %c0_i32 : i32, i32, i32
  }
  func.func @transform_3(%arg0: i32, %arg1: i32) -> (i32, i32, i32) {
    %c0_i32 = arith.constant 0 : i32
    %c0_i32_0 = arith.constant 0 : i32
    %c0_i32_1 = arith.constant 0 : i32
    return %arg0, %c0_i32, %c0_i32_0 : i32, i32, i32
  }
}

</mosaic_0001>

<bundles_post_ra>
// kernel: tile.13
= control target key start
LH: loop header
LB: loop body
LE: loop exit
PB: predicated region body
PF: predicated region fallthrough
CT: control target
= control target key end

     0   :  { %s28_s0 = inlined_call_operand.vmem [shape: f32[8], index: 0, kind: input, shape index: {}]   ;;  %s29_s1 = inlined_call_operand.vmem [shape: f32[16,8], index: 1, kind: output, shape index: {}]  }
   0x1   :  { %v4_v0 = vld [vmem:[%s28_s0] ss:$0 sm:$0xff] }
   0x2   :  { %5 = vst [vmem:[%s29_s1] sm:$0xff] %v4_v0  ;;  %8 = vst [vmem:[%s29_s1 + $0x8] sm:$0xff] %v4_v0 }

// kernel: tile.14
= control target key start
LH: loop header
LB: loop body
LE: loop exit
PB: predicated region body
PF: predicated region fallthrough
CT: control target
= control target key end

     0   :  { %s133_s10 = smov 120   ;;  %s134_s11 = smov 104   ;;  %vm3_vm0 = vcmask 64512   ;;  %vm9_vm1 = vcmask 1048512   ;;  %vm15_vm2 = vcmask 982912   ;;  %vm21_vm3 = vcmask 917312   ;;  %s209_s0 = inlined_call_operand.vmem [shape: f32[16,8], index: 0, kind: input, shape index: {}]   ;;  %s210_s1 = inlined_call_operand.vmem [shape: f32[1,128], index: 1, kind: output, shape index: {}]  }
   0x1   :  { %v103_v0 = vld [vmem:[%s209_s0 + $0xf] sm:$0x1]   ;;  %v105_v1 = vld [vmem:[%s209_s0 + $0xd] sm:$0x1]   ;;  %v104_v2 = vld [vmem:[%s209_s0 + $0xe] sm:$0x1]  }
   0x2   :  { %7 = vrot.lane.b32.xlu0 %v103_v0, %s133_s10  ;;  %19 = vrot.lane.b32.xlu1 %v105_v1, %s134_s11  ;;  %v106_v3 = vld [vmem:[%s209_s0 + $0xc] sm:$0x1]   ;;  %s135_s16 = smov 112   ;;  %s136_s17 = smov 96   ;;  %v107_v4 = vld [vmem:[%s209_s0 + $0xb] sm:$0x1]  }
   0x3   :  { %v108_v5 = vld [vmem:[%s209_s0 + $0xa] sm:$0x1]   ;;  %v2_v6 = vld [vmem:[%s209_s0] sm:$0x1]   ;;  %s137_s24 = smov 88   ;;  %s138_s25 = smov 80  }
   0x4   :  { %4 = vst.msk [vmem:[#allocation0] sm:$0x1] %vm3_vm0, %v2_v6   ;;  %v109_v7 = vld [vmem:[%s209_s0 + $0x9] sm:$0x1]   ;;  %v110_v8 = vld [vmem:[%s209_s0 + $0x8] sm:$0x1]  }
   0x5   :  { %s139_s30 = smov 72   ;;  %s140_s2 = smov 64   ;;  %v111_v9 = vld [vmem:[%s209_s0 + $0x7] sm:$0x1]   ;;  %v112_v10 = vld [vmem:[%s209_s0 + $0x6] sm:$0x1]  }
   0x6   :  { %13 = vrot.lane.b32.xlu0 %v104_v2, %s135_s16  ;;  %25 = vrot.lane.b32.xlu1 %v106_v3, %s136_s17  ;;  %s141_s7 = smov 56   ;;  %s142_s8 = smov 48   ;;  %v113_v11 = vld [vmem:[%s209_s0 + $0x5] sm:$0x1]   ;;  %v114_v12 = vld [vmem:[%s209_s0 + $0x4] sm:$0x1]  }
   0x7   :  { %s143_s13 = smov 40   ;;  %s144_s14 = smov 32   ;;  %v115_v13 = vld [vmem:[%s209_s0 + $0x3] sm:$0x1]   ;;  %v116_v14 = vld [vmem:[%s209_s0 + $0x2] sm:$0x1]  }
   0x8   :  { %s145_s19 = smov 24   ;;  %s146_s20 = smov 16   ;;  %v117_v15 = vld [vmem:[%s209_s0 + $0x1] sm:$0x1]   ;;  %vm27_vm4 = vcmask 851712   ;;  %vm33_vm5 = vcmask 786112  }
   0x9   :  { %s147_s0 = smov 8   ;;  %vm39_vm6 = vcmask 720512   ;;  %vm45_vm7 = vcmask 654912   ;;  %vm51_vm8 = vcmask 589312   ;;  %vm57_vm9 = vcmask 523712  }
   0xa   :  { %31 = vrot.lane.b32.xlu0 %v107_v4, %s137_s24  ;;  %37 = vrot.lane.b32.xlu1 %v108_v5, %s138_s25  ;;  %vm63_vm10 = vcmask 458112   ;;  %vm69_vm11 = vcmask 392512   ;;  %vm75_vm12 = vcmask 326912   ;;  %vm81_vm13 = vcmask 261312  }
   0xb   :  { %vm87_vm14 = vcmask 195712   ;;  %vm93_vm15 = vcmask 130112  }
   0xe   :  { %43 = vrot.lane.b32.xlu0 %v109_v7, %s139_s30  ;;  %49 = vrot.lane.b32.xlu1 %v110_v8, %s140_s2 }
  0x12   :  { %55 = vrot.lane.b32.xlu0 %v111_v9, %s141_s7  ;;  %61 = vrot.lane.b32.xlu1 %v112_v10, %s142_s8 }
  0x16   :  { %67 = vrot.lane.b32.xlu0 %v113_v11, %s143_s13  ;;  %73 = vrot.lane.b32.xlu1 %v114_v12, %s144_s14 }
  0x1a   :  { %79 = vrot.lane.b32.xlu0 %v115_v13, %s145_s19  ;;  %85 = vrot.lane.b32.xlu1 %v116_v14, %s146_s20 }
  0x1e   :  { %91 = vrot.lane.b32.xlu0 %v117_v15, %s147_s0 }
  0x74   :  { %v8_v16 = vpop.permute.xlu0 %7   ;;  %v20_v17 = vpop.permute.xlu1 %19  }
  0x75   :  { %10 = vst.msk [vmem:[#allocation0] sm:$0x1] %vm9_vm1, %v8_v16  }
  0x78   :  { %v14_v18 = vpop.permute.xlu0 %13   ;;  %v26_v19 = vpop.permute.xlu1 %25  }
  0x79   :  { %16 = vst.msk [vmem:[#allocation0] sm:$0x1] %vm15_vm2, %v14_v18  }
  0x7a   :  { %22 = vst.msk [vmem:[#allocation0] sm:$0x1] %vm21_vm3, %v20_v17  }
  0x7b   :  { %28 = vst.msk [vmem:[#allocation0] sm:$0x1] %vm27_vm4, %v26_v19  }
  0x7c   :  { %v32_v20 = vpop.permute.xlu0 %31   ;;  %v38_v21 = vpop.permute.xlu1 %37  }
  0x7d   :  { %34 = vst.msk [vmem:[#allocation0] sm:$0x1] %vm33_vm5, %v32_v20  }
  0x7e   :  { %40 = vst.msk [vmem:[#allocation0] sm:$0x1] %vm39_vm6, %v38_v21  }
  0x80   :  { %v44_v22 = vpop.permute.xlu0 %43   ;;  %v50_v23 = vpop.permute.xlu1 %49  }
  0x81   :  { %46 = vst.msk [vmem:[#allocation0] sm:$0x1] %vm45_vm7, %v44_v22  }
  0x82   :  { %52 = vst.msk [vmem:[#allocation0] sm:$0x1] %vm51_vm8, %v50_v23  }
  0x84   :  { %v56_v24 = vpop.permute.xlu0 %55   ;;  %v62_v25 = vpop.permute.xlu1 %61  }
  0x85   :  { %58 = vst.msk [vmem:[#allocation0] sm:$0x1] %vm57_vm9, %v56_v24  }
  0x86   :  { %64 = vst.msk [vmem:[#allocation0] sm:$0x1] %vm63_vm10, %v62_v25  }
  0x88   :  { %v68_v26 = vpop.permute.xlu0 %67   ;;  %v74_v27 = vpop.permute.xlu1 %73  }
  0x89   :  { %70 = vst.msk [vmem:[#allocation0] sm:$0x1] %vm69_vm11, %v68_v26  }
  0x8a   :  { %76 = vst.msk [vmem:[#allocation0] sm:$0x1] %vm75_vm12, %v74_v27  }
  0x8c   :  { %v80_v28 = vpop.permute.xlu0 %79   ;;  %v86_v29 = vpop.permute.xlu1 %85  }
  0x8d   :  { %82 = vst.msk [vmem:[#allocation0] sm:$0x1] %vm81_vm13, %v80_v28  }
  0x8e   :  { %88 = vst.msk [vmem:[#allocation0] sm:$0x1] %vm87_vm14, %v86_v29  }
  0x90   :  { %v92_v30 = vpop.permute.xlu0 %91  }
  0x91   :  { %94 = vst.msk [vmem:[#allocation0] sm:$0x1] %vm93_vm15, %v92_v30  }
  0x98   :  { %v99_v31 = vld [vmem:[#allocation0] sm:$0x1] }
  0x99   :  { %102 = vst [vmem:[%s210_s1] sm:$0x1] %v99_v31 }

// kernel: conv_bn_relu_forward.3
= control target key start
LH: loop header
LB: loop body
LE: loop exit
PB: predicated region body
PF: predicated region fallthrough
CT: control target
= control target key end

     0   :  { %s420_s12 = smov 0   ;;  %s422_s13 = smov 0   ;;  %s471_s0 = inlined_call_operand.vmem [shape: f32[2,16,128], index: 0, kind: input, shape index: {}]   ;;  %s472_s1 = inlined_call_operand.vmem [shape: f32[1,128], index: 1, kind: input, shape index: {}]   ;;  %s473_s2 = inlined_call_operand.vmem [shape: f32[1,128], index: 2, kind: input, shape index: {}]   ;;  %s474_s3 = inlined_call_operand.vmem [shape: f32[2,16,128], index: 3, kind: output, shape index: {}]  }
   0x1   :  { %s424_s14 = smov 0   ;;  %s426_s15 = smov 0  }
   0x2   :  { %s428_s16 = smov 0  }
   0x3 LB: > { %s22_s17 = sadd.s32 1, %s390_s14  ;;  %s25_s18 = sadd.s32 1, %s394_s15  ;;  %s398_s16 = sphi %s428_s16, %s13_s16   ;;  %s394_s15 = sphi %s426_s15, %s478_s15   ;;  %s390_s14 = sphi %s424_s14, %s477_s14   ;;  %s386_s13 = sphi %s422_s13, %s476_s13   ;;  %s382_s12 = sphi %s420_s12, %s475_s12  }
   0x4   : > { %p23_p0 = scmp.ge.s32.totalorder %s22_s17, 2  ;;  %p311_p1 = scmp.ge.s32.totalorder %s398_s16, 1 }
   0x5   : > { %p156_p2 = scmp.lt.s32.totalorder %s398_s16, 5 }
   0x6   : > { %s480_s17 = smov (%p23_p0, %s22_s17), 0  ;;  %s482_s18 = smov (!%p23_p0, %s25_s18), %s394_s15 }
   0x7   : > { %p157_p3 = pnand %p311_p1, %p156_p2  ;;  %p27_p4 = scmp.ge.s32.totalorder %s482_s18, 2 }
   0x8   : > { %p186_p5 = scmp.lt.s32.totalorder (!%p157_p3), %s386_s13, 1  ;;  %p188_p6 = scmp.lt.s32.totalorder (!%p157_p3), %s382_s12, 1 }
   0x9   : > { %s484_s18 = smov (%p27_p4, %s482_s18), 0  ;;  %160 = sbr.rel (%p157_p3) target bundleno = 27 (0x1b), region = 32 }
   0xe   : > { %s486_s13 = smov (!%p186_p5, %s386_s13), 1  ;;  %s488_s12 = smov (!%p188_p6, %s382_s12), 1  ;;  %v316_v0 = vld [vmem:[%s472_s1] ss:$0 sm:$0xff] }
   0xf   : > { %s312_s19 = sshll.u32 %s486_s13, 1  ;;  %v317_v2 = vld [vmem:[%s473_s2] ss:$0 sm:$0xff] }
  0x10   : > { %s191_s20 = sadd.s32 %s312_s19, %s488_s12 }
  0x11   : > { %s313_s21 = sshll.u32 %s191_s20, 3 }
  0x12   : > { %s193_s26 = scalar_lea.vmem %s471_s0, %s313_s21  ;;  %s201_s4 = scalar_lea.vmem %s474_s3, %s313_s21 }
  0x13   : > { %v202_v1 = vld [vmem:[%s193_s26] sm:$0xff] }
  0x14   : > { %v210_v3 = vmul.f32 %v316_v0, %v202_v1 }
  0x16   : > { %v218_v4 = vadd.f32 %v317_v2, %v210_v3 }
  0x18   : > { %v219_v5 = vmax.f32 %v218_v4, 0.0 }
  0x1a   : > { %220 = vst [vmem:[%s201_s4] sm:$0xff] %v219_v5 }
  0x1b PF: > { %s13_s16 = sadd.s32 1, %s398_s16   ;;  %s475_s12 = smov %s390_s14 }
  0x1c   : > { %p10_p7 = scmp.ge.s32.totalorder %s13_s16, 6   ;;  %s476_s13 = smov %s394_s15 }
  0x1d   : > { %s477_s14 = smov %s480_s17  ;;  %s478_s15 = smov %s484_s18 }
  0x1e   :  { %12 = sbr.rel (!%p10_p7) target bundleno = 3 (0x3), region = 62 }

// kernel: conv_bn_relu_forward.2
= control target key start
LH: loop header
LB: loop body
LE: loop exit
PB: predicated region body
PF: predicated region fallthrough
CT: control target
= control target key end

     0   :  { %s838_s12 = smov 0   ;;  %s840_s13 = smov 0   ;;  %s1014_s0 = inlined_call_operand.vmem [shape: f32[2,18,64], index: 0, kind: input, shape index: {}]   ;;  %s1015_s1 = inlined_call_operand.vmem [shape: f32[3,64,128], index: 1, kind: input, shape index: {}]   ;;  %s1016_s2 = inlined_call_operand.vmem [shape: f32[2,16,128], index: 2, kind: output, shape index: {0}]   ;;  %s1017_s3 = inlined_call_operand.vmem [shape: f32[2,2,128], index: 3, kind: output, shape index: {1}]  }
   0x1   :  { %s842_s14 = smov 0   ;;  %s844_s15 = smov 0  }
   0x2   :  { %s846_s16 = smov 0  }
   0x3 LB: > { %s23_s17 = sadd.s32 1, %s805_s14  ;;  %s26_s18 = sadd.s32 1, %s809_s15  ;;  %s813_s16 = sphi %s846_s16, %s14_s16   ;;  %s809_s15 = sphi %s844_s15, %s1021_s15   ;;  %s805_s14 = sphi %s842_s14, %s1020_s14   ;;  %s801_s13 = sphi %s840_s13, %s1019_s13   ;;  %s797_s12 = sphi %s838_s12, %s1018_s12  }
   0x4   : > { %p24_p0 = scmp.ge.s32.totalorder %s23_s17, 2  ;;  %p615_p1 = scmp.ge.s32.totalorder %s813_s16, 1 }
   0x5   : > { %p154_p2 = scmp.lt.s32.totalorder %s813_s16, 5 }
   0x6   : > { %s1023_s17 = smov (%p24_p0, %s23_s17), 0  ;;  %s1025_s18 = smov (!%p24_p0, %s26_s18), %s809_s15 }
   0x7   : > { %p155_p3 = pnand %p615_p1, %p154_p2  ;;  %p28_p4 = scmp.ge.s32.totalorder %s1025_s18, 2 }
   0x8   : > { %p185_p5 = scmp.lt.s32.totalorder (!%p155_p3), %s801_s13, 1  ;;  %s620_s23 = sshll.u32 (!%p155_p3), %s797_s12, 3 }
   0x9   : > { %s1027_s18 = smov (%p28_p4, %s1025_s18), 0  ;;  %158 = sbr.rel (%p155_p3) target bundleno = 270 (0x10e), region = 28 }
   0xa   : > { %p192_p6 = scmp.lt.s32.totalorder (!%p155_p3), %s797_s12, 1  ;;  %p644_p7 = scmp.ne.s32.totalorder (!%p155_p3), %s797_s12, 0 }
   0xe   : > { %v214_v0 = vld [vmem:[%s1015_s1 + $0x38] sm:$0xff]  ;;  %v815_v2 = vmov 0.0   ;;  %v213_v3 = vld [vmem:[%s1015_s1 + $0x30] sm:$0xff]  ;;  %s1029_s13 = smov (!%p185_p5, %s801_s13), 1  ;;  %v212_v5 = vld [vmem:[%s1015_s1 + $0x28] sm:$0xff]  ;;  %vm215_vm0 = vcmask 523264  }
   0xf   : > { %v631_v1 = vld [vmem:[%s1015_s1 + $0x78] sm:$0xff]  ;;  %674 = vmatprep.subr.mxu0 %v815_v2  ;;  %693 = vmatprep.subr.mxu1 %v815_v2  ;;  %v630_v4 = vld [vmem:[%s1015_s1 + $0x70] sm:$0xff]  ;;  %v629_v6 = vld [vmem:[%s1015_s1 + $0x68] sm:$0xff]  ;;  %s731_s4 = smul.u32 24, %s1029_s13  ;;  %vm816_vm1 = vmmov 0   ;;  %s617_s7 = sshll.u32 %s1029_s13, 1 }
  0x10   : > { %675 = vmatpush3.msra.mxu0 %v214_v0  ;;  %694 = vmatpush3.msra.mxu1 %v631_v1  ;;  %v211_v7 = vld [vmem:[%s1015_s1 + $0x20] sm:$0xff]  ;;  %v210_v9 = vld [vmem:[%s1015_s1 + $0x18] sm:$0xff]  ;;  %v209_v11 = vld [vmem:[%s1015_s1 + $0x10] sm:$0xff]  ;;  %s988_s10 = scalar_lea.vmem %s1017_s3, %s617_s7  ;;  %vm482_vm2 = vcmask 1040384  }
  0x11   : > { %676 = vmatprep.subr.mxu0 %v815_v2  ;;  %695 = vmatprep.subr.mxu1 %v815_v2  ;;  %v628_v8 = vld [vmem:[%s1015_s1 + $0x60] sm:$0xff]  ;;  %v627_v10 = vld [vmem:[%s1015_s1 + $0x58] sm:$0xff]  ;;  %s189_s22 = scalar_lea.vmem %s1014_s0, %s731_s4  ;;  %v626_v12 = vld [vmem:[%s1015_s1 + $0x50] sm:$0xff] }
  0x12   : > { %677 = vmatpush3.msra.mxu0 %v213_v3  ;;  %696 = vmatpush3.msra.mxu1 %v630_v4  ;;  %v208_v13 = vld [vmem:[%s1015_s1 + $0x8] sm:$0xff]  ;;  %s931_s5 = scalar_lea.vmem %s189_s22, %s620_s23  ;;  %v207_v15 = vld [vmem:[%s1015_s1] sm:$0xff]  ;;  %v642_v19 = vld [vmem:[%s1015_s1 + $0xb8] sm:$0xff] }
  0x13   : > { %678 = vmatprep.subr.mxu0 %v815_v2  ;;  %697 = vmatprep.subr.mxu1 %v815_v2  ;;  %v625_v14 = vld [vmem:[%s1015_s1 + $0x48] sm:$0xff]  ;;  %v205_v16 = vld [vmem:[%s931_s5] sm:$0xff]  ;;  %v641_v20 = vld [vmem:[%s1015_s1 + $0xb0] sm:$0xff]  ;;  %s193_s11 = scalar_select %p192_p6, %s797_s12, 1 }
  0x14   : > { %679 = vmatpush3.msra.mxu0 %v212_v5  ;;  %698 = vmatpush3.msra.mxu1 %v629_v6  ;;  %v624_v17 = vld [vmem:[%s1015_s1 + $0x40] sm:$0xff]  ;;  %v640_v21 = vld [vmem:[%s1015_s1 + $0xa8] sm:$0xff]  ;;  %v638_v23 = vld [vmem:[%s1015_s1 + $0x98] sm:$0xff] }
  0x15   : > { %680 = vmatprep.subr.mxu0 %v815_v2  ;;  %699 = vmatprep.subr.mxu1 %v815_v2  ;;  %v623_v18 = vld [vmem:[%s931_s5 + $0x1] sm:$0xff]  ;;  %v637_v24 = vld [vmem:[%s1015_s1 + $0x90] sm:$0xff]  ;;  %s195_s19 = sadd.s32 %s617_s7, %s193_s11 }
  0x16   : > { %681 = vmatpush3.msra.mxu0 %v211_v7  ;;  %700 = vmatpush3.msra.mxu1 %v628_v8  ;;  %v639_v22 = vld [vmem:[%s1015_s1 + $0xa0] sm:$0xff]  ;;  %v636_v25 = vld [vmem:[%s1015_s1 + $0x88] sm:$0xff]  ;;  %s618_s20 = sshll.u32 %s195_s19, 3 }
  0x17   : > { %682 = vmatprep.subr.mxu0 %v815_v2  ;;  %701 = vmatprep.subr.mxu1 %v815_v2  ;;  %v635_v26 = vld [vmem:[%s1015_s1 + $0x80] sm:$0xff]  ;;  %s197_s22 = scalar_lea.vmem %s1016_s2, %s618_s20 }
  0x18   : > { %683 = vmatpush3.msra.mxu0 %v210_v9  ;;  %702 = vmatpush3.msra.mxu1 %v627_v10  ;;  %v634_v27 = vld [vmem:[%s931_s5 + $0x2] sm:$0xff] }
  0x19   : > { %684 = vmatprep.subr.mxu0 %v815_v2  ;;  %703 = vmatprep.subr.mxu1 %v815_v2 }
  0x1a   : > { %685 = vmatpush3.msra.mxu0 %v209_v11  ;;  %704 = vmatpush3.msra.mxu1 %v626_v12 }
  0x1b   : > { %686 = vmatprep.subr.mxu0 %v815_v2  ;;  %705 = vmatprep.subr.mxu1 %v815_v2 }
  0x1c   : > { %687 = vmatpush3.msra.mxu0 %v208_v13  ;;  %706 = vmatpush3.msra.mxu1 %v625_v14 }
  0x1d   : > { %688 = vmatprep.subr.mxu0 %v815_v2  ;;  %690 = vmatprep.mubr.msk.f32.mxu0 %vm816_vm1, %v815_v2 }
  0x1e   : > { %689 = vmatpush3.msra.mxu0 %v207_v15  ;;  %707 = vmatprep.subr.mxu1 %v815_v2 }
  0x1f   : > { %691 = vmatmul.mubr.msk.f32.vlgmr.msra.gmra.mxu0 %vm215_vm0, %v205_v16  ;;  %708 = vmatpush3.msra.mxu1 %v624_v17 }
  0x20   : > { %709 = vmatprep.mubr.msk.f32.mxu1 %vm816_vm1, %v815_v2  ;;  %712 = vmatprep.subr.mxu0 %v815_v2 }
  0x21   : > { %710 = vmatmul.mubr.msk.f32.vlgmr.msra.gmra.mxu1 %vm215_vm0, %v623_v18  ;;  %713 = vmatpush3.msra.mxu0 %v642_v19 }
  0x22   : > { %714 = vmatprep.subr.mxu0 %v815_v2  ;;  %728 = vmatprep.mubr.msk.f32.mxu0 %vm816_vm1, %v815_v2 }
  0x23   : > { %715 = vmatpush3.msra.mxu0 %v641_v20 }
  0x24   : > { %716 = vmatprep.subr.mxu0 %v815_v2 }
  0x25   : > { %717 = vmatpush3.msra.mxu0 %v640_v21 }
  0x26   : > { %718 = vmatprep.subr.mxu0 %v815_v2 }
  0x27   : > { %719 = vmatpush3.msra.mxu0 %v639_v22 }
  0x28   : > { %720 = vmatprep.subr.mxu0 %v815_v2 }
  0x29   : > { %721 = vmatpush3.msra.mxu0 %v638_v23 }
  0x2a   : > { %722 = vmatprep.subr.mxu0 %v815_v2 }
  0x2b   : > { %723 = vmatpush3.msra.mxu0 %v637_v24 }
  0x2c   : > { %724 = vmatprep.subr.mxu0 %v815_v2 }
  0x2d   : > { %725 = vmatpush3.msra.mxu0 %v636_v25 }
  0x2e   : > { %726 = vmatprep.subr.mxu0 %v815_v2 }
  0x2f   : > { %727 = vmatpush3.msra.mxu0 %v635_v26 }
  0x30   : > { %729 = vmatmul.mubr.msk.f32.vlgmr.msra.gmra.mxu0 %vm215_vm0, %v634_v27 }
  0xdf   : > { %v285_v28 = vpop.f32.mrf.mxu0 }
  0xe1   : > { %v373_v29 = vpop.f32.mrf.mxu1  ;;  %v692_v30 = vpop.f32.mrf.mxu0 }
  0xe2   : > { %v377_v32 = vadd.f32 %v373_v29, %v285_v28 }
  0xe3   : > { %v711_v31 = vpop.f32.mrf.mxu1 }
  0xf0   : > { %v461_v33 = vpop.f32.mrf.mxu0 }
  0xf1   : > { %v465_v34 = vadd.f32 %v461_v33, %v377_v32 }
  0xf2   : > { %v730_v35 = vpop.f32.mrf.mxu0 }
  0xf3   : > { %468 = vst [vmem:[%s197_s22] sm:$0xff] %v465_v34  ;;  %v469_v36 = vrot.slane %v465_v34, 4  ;;  %v475_v37 = vmul.f32 %v465_v34, %v465_v34 }
  0xf5   : > { %v470_v38 = vadd.f32 %v469_v36, %v465_v34  ;;  %v476_v39 = vrot.slane %v475_v37, 4 }
  0xf7   : > { %v471_v40 = vrot.slane %v470_v38, 2  ;;  %v477_v41 = vadd.f32 %v476_v39, %v475_v37 }
  0xf9   : > { %v472_v42 = vadd.f32 %v471_v40, %v470_v38  ;;  %v478_v43 = vrot.slane %v477_v41, 2 }
  0xfb   : > { %v473_v44 = vrot.slane %v472_v42, 1  ;;  %v479_v45 = vadd.f32 %v478_v43, %v477_v41 }
  0xfd   : > { %v480_v46 = vrot.slane %v479_v45, 1  ;;  %v474_v47 = vadd.f32 %v473_v44, %v472_v42  ;;  %487 = sbr.rel (%p644_p7) target bundleno = 260 (0x104), region = 32 }
  0xff   : > { %v481_v48 = vadd.f32 %v480_v46, %v479_v45 }
 0x101   : > { %v483_v49 = vsel %vm482_vm2, %v474_v47, %v481_v48 }
 0x102   : > { %v817_v50 = vmov 0.0  }
 0x103   : > { %488 = vst [vmem:[%s988_s10] sm:$0x3] %v817_v50 }
 0x104 PF:  {}
 0x10a   : > { %v489_v51 = vld [vmem:[%s988_s10] sm:$0x3] }
 0x10b   : > { %v490_v52 = vadd.f32 %v489_v51, %v483_v49 }
 0x10d   : > { %491 = vst [vmem:[%s988_s10] sm:$0x3] %v490_v52 }
 0x10e PF: > { %s14_s16 = sadd.s32 1, %s813_s16   ;;  %s1018_s12 = smov %s805_s14 }
 0x10f   : > { %p11_p8 = scmp.ge.s32.totalorder %s14_s16, 6   ;;  %s1019_s13 = smov %s809_s15 }
 0x110   : > { %s1020_s14 = smov %s1023_s17  ;;  %s1021_s15 = smov %s1027_s18 }
 0x111   :  { %13 = sbr.rel (!%p11_p8) target bundleno = 3 (0x3), region = 79 }

</bundles_post_ra>
